<compile_context>
chip_gen: v7x
topology: tpu7x:2x2x1
jax: 0.10.0
libtpu: 0.0.40
codegen_flags: <defaults>
</compile_context>

<pallas_src>
import math
from functools import partial

import jax
import jax.numpy as jnp
from jax.experimental import pallas as pl
from jax.experimental.pallas import tpu as pltpu


def make_pe_table(d_model: int, length: int, dtype=jnp.float32) -> jnp.ndarray:
    """Deterministic sinusoidal PE table, shape (1, length, d_model)."""
    position = jnp.arange(length, dtype=jnp.float32)[:, None]            # (L, 1)
    div_term = jnp.exp(
        jnp.arange(0, d_model, 2, dtype=jnp.float32) * (-math.log(10000.0) / d_model)
    )                                                                     # (D/2,)
    pe = jnp.zeros((length, d_model), dtype=jnp.float32)
    pe = pe.at[:, 0::2].set(jnp.sin(position * div_term))
    pe = pe.at[:, 1::2].set(jnp.cos(position * div_term))
    return pe[None].astype(dtype)                                         # (1, L, D)


def _add_pe_kernel(x_ref, pe_ref, o_ref):
    """out = x + pe (pe broadcast over the batch-tile rows); eval mode."""
    y = x_ref[...].astype(jnp.float32) + pe_ref[...].astype(jnp.float32)
    o_ref[...] = y.astype(o_ref.dtype)


def _add_pe_dropout_kernel(x_ref, pe_ref, u_ref, o_ref, *, p):
    """out = inverted_dropout(x + pe, p) using a streamed uniform tile."""
    y = x_ref[...].astype(jnp.float32) + pe_ref[...].astype(jnp.float32)
    keep = u_ref[...] >= jnp.float32(p)
    y = jnp.where(keep, y * jnp.float32(1.0 / (1.0 - p)), jnp.zeros_like(y))
    o_ref[...] = y.astype(o_ref.dtype)


def _pick_tiles(B, N, itemsize, target_bytes):
    """Pick (batch_tile, lane_tile) so blocks are lane-dense and ~target_bytes."""
    if N % 128 == 0:
        # lane-dense tile sized so that 8 sublane rows fit the budget
        tn = min(N, max(128, (target_bytes // (8 * itemsize)) // 128 * 128))
    else:
        tn = N  # full extent of the flattened axis (layout rule fallback)
    rows = max(1, target_bytes // (tn * itemsize))
    tb = B if rows >= B else min(B, max(8, (rows // 8) * 8))
    return tb, tn


def positional_encoding(x, pe, *, p=0.1, training=False, rng_key=None,
                        target_block_bytes=1 << 20):
    """x: (B, L, D); pe: (1, length, d_model) with length >= L, d_model >= D."""
    B, L, D = x.shape
    N = L * D
    itemsize = jnp.dtype(x.dtype).itemsize

    # Lane-dense flattened views.
    x2 = x.reshape(B, N)
    pe2 = pe[:, :L, :D].astype(x.dtype).reshape(1, N)

    tb, tn = _pick_tiles(B, N, itemsize, target_block_bytes)
    # L*D tiles outer, batch inner -> pe tile stays VMEM-resident across batch.
    grid = (pl.cdiv(N, tn), pl.cdiv(B, tb))

    x_spec = pl.BlockSpec((tb, tn), lambda n, b: (b, n))
    pe_spec = pl.BlockSpec((1, tn), lambda n, b: (0, n))      # constant over batch
    out_spec = pl.BlockSpec((tb, tn), lambda n, b: (b, n))

    if training and p > 0.0:
        if rng_key is None:
            rng_key = jax.random.PRNGKey(0)
        # TODO(synk): use the in-kernel HW PRNG (pltpu.prng_seed /
        # prng_random_bits + pltpu.bitcast) to avoid this extra HBM read; the
        # host-side draw keeps the kernel runnable under interpret/CPU as well.
        u = jax.random.uniform(rng_key, (B, N), dtype=jnp.float32)
        kernel = partial(_add_pe_dropout_kernel, p=float(p))
        in_specs = [x_spec, pe_spec, pl.BlockSpec((tb, tn), lambda n, b: (b, n))]
        args = (x2, pe2, u)
    else:
        kernel = _add_pe_kernel
        in_specs = [x_spec, pe_spec]
        args = (x2, pe2)

    out2 = pl.pallas_call(
        kernel,
        out_shape=jax.ShapeDtypeStruct((B, N), x.dtype),
        grid_spec=pltpu.PrefetchScalarGridSpec(
            num_scalar_prefetch=0,
            grid=grid,
            in_specs=in_specs,
            out_specs=out_spec,
        ),
        input_output_aliases={0: 0},  # donate x's (flattened) HBM buffer
        compiler_params=pltpu.CompilerParams(
            dimension_semantics=("parallel", "parallel")),
    )(*args)
    return out2.reshape(B, L, D)


if __name__ == "__main__":
    # Module config: d_model=32, length=8  (pe buffer shape (1, 8, 32))
    d_model, length = 32, 8
    B, L, D = 2, 8, 32

    pe = make_pe_table(d_model, length)                      # deterministic buffer
    key = jax.random.PRNGKey(0)
    x = jax.random.normal(key, (B, L, D), dtype=jnp.float32)

    ref = x + pe[:, :L, :D]

    # Eval-mode forward (dropout is identity) -- exact check against reference.
    out_eval = jax.block_until_ready(positional_encoding(x, pe, p=0.1, training=False))
    assert out_eval.shape == (B, L, D)
    assert jnp.allclose(out_eval, ref, atol=1e-6), "eval-mode mismatch"

    # Training-mode forward: every output element is either 0 (dropped) or the
    # reference value scaled by 1/(1-p) (kept).
    out_train = jax.block_until_ready(
        positional_encoding(x, pe, p=0.1, training=True,
                            rng_key=jax.random.PRNGKey(1234)))
    assert out_train.shape == (B, L, D)
    scaled = ref / (1.0 - 0.1)
    ok = jnp.isclose(out_train, 0.0) | jnp.isclose(out_train, scaled, atol=1e-5)
    assert bool(ok.all()), "training-mode dropout values inconsistent"

    print("KERNEL_OK")
</pallas_src>

<mosaic_0001>
module attributes {stable_mosaic.version = 11 : i64} {
  func.func @_add_pe_kernel(%arg0: i32, %arg1: i32, %arg2: memref<2x256xf32, #tpu.memory_space<vmem>>, %arg3: memref<1x256xf32, #tpu.memory_space<vmem>>, %arg4: memref<2x256xf32, #tpu.memory_space<vmem>>) attributes {dimension_semantics = [#tpu.dimension_semantics<parallel>, #tpu.dimension_semantics<parallel>], iteration_bounds = array<i64: 1, 1>, scalar_prefetch = 0 : i64, scratch_operands = 0 : i64, tpu.core_type = #tpu.core_type<tc>, window_params = [{transform_indices = @transform_0, window_bounds = array<i64: 2, 256>}, {transform_indices = @transform_1, window_bounds = array<i64: 1, 256>}, {transform_indices = @transform_2, window_bounds = array<i64: 2, 256>}]} {
    %c0 = arith.constant 0 : index
    %c0_0 = arith.constant 0 : index
    %0 = vector.load %arg2[%c0, %c0_0] : memref<2x256xf32, #tpu.memory_space<vmem>>, vector<2x256xf32>
    %c0_1 = arith.constant 0 : index
    %c0_2 = arith.constant 0 : index
    %1 = vector.load %arg3[%c0_1, %c0_2] : memref<1x256xf32, #tpu.memory_space<vmem>>, vector<1x256xf32>
    %2 = vector.broadcast %1 : vector<1x256xf32> to vector<2x256xf32>
    %3 = arith.addf %0, %2 : vector<2x256xf32>
    %c0_3 = arith.constant 0 : index
    %c0_4 = arith.constant 0 : index
    %4 = vector.load %arg4[%c0_3, %c0_4] : memref<2x256xf32, #tpu.memory_space<vmem>>, vector<2x256xf32>
    tpu.vector_store %arg4[%c0_3, %c0_4], %3 {strides = array<i32>} : memref<2x256xf32, #tpu.memory_space<vmem>>, vector<2x256xf32>,
    return
  }
  func.func @transform_0(%arg0: i32, %arg1: i32) -> (i32, i32) {
    %c0_i32 = arith.constant 0 : i32
    return %arg1, %arg0 : i32, i32
  }
  func.func @transform_1(%arg0: i32, %arg1: i32) -> (i32, i32) {
    %c0_i32 = arith.constant 0 : i32
    %c0_i32_0 = arith.constant 0 : i32
    return %c0_i32, %arg0 : i32, i32
  }
  func.func @transform_2(%arg0: i32, %arg1: i32) -> (i32, i32) {
    %c0_i32 = arith.constant 0 : i32
    return %arg1, %arg0 : i32, i32
  }
}

</mosaic_0001>

<bundles_post_ra>
// kernel: tpu_custom_call.1
= control target key start
LH: loop header
LB: loop body
LE: loop exit
PB: predicated region body
PF: predicated region fallthrough
CT: control target
= control target key end

     0   :  { %7 = vsyncpa [#allocation3], 0  ;;  %s157_s0 = inlined_call_operand.hbm [shape: f32[2,256], index: 0, kind: input, shape index: {}, may-alias: {0,2}]   ;;  %s158_s1 = inlined_call_operand.vmem [shape: f32[1,256], index: 1, kind: input, shape index: {}]   ;;  %s159_s2 = inlined_call_operand.hbm [shape: f32[2,256], index: 2, kind: output, shape index: {}, may-alias: {0,2}]  }
   0x1   :  { %8 = vsyncpa [#allocation4], 0  ;;  %s112_s9 = smov [#allocation2]   ;;  %s64_s13 = scalar_lea.hbm %s157_s0, 64 }
   0x2   :  { %s15_s10 = sshll.u32 %s112_s9, 4  ;;  %p65_p0 = scmp.ne.s32.totalorder %s157_s0, %s64_s13  ;;  %s16_s10 = int_to_ptr.vmem [resolvable:$true] %s15_s10 }
   0x3   :  { %p68_p1 = scmp.lt.u32.totalorder %s64_s13, %s157_s0 }
   0x5   :  { %p70_p2 = pnand %p68_p1, %p65_p0 }
   0x7   :  { %73 = shalt.err (!%p70_p2)
}
   0x8   :  { %s74_s18 = scalar_lea.vmem %s16_s10, 64  ;;  %p79_p4 = scmp.lt.s32.totalorder %s16_s10, %s16_s10 }
   0x9   :  { %p75_p3 = scmp.ne.s32.totalorder %s16_s10, %s74_s18  ;;  %p80_p5 = scmp.lt.s32.totalorder %s74_s18, %s74_s18 }
   0xb   :  { %p81_p6 = por %p80_p5, %p79_p4 }
   0xd   :  { %p82_p7 = pnand %p81_p6, %p75_p3 }
   0xf   :  { %85 = shalt.err (!%p82_p7)
}
  0x10   :  { %18 = dma.hbm_to_vmem [thread:$0]  %s157_s0, 64, %s16_s10, [#allocation3]  }
  0x11   :  { %108 = dma.done.wait [#allocation3], 64  }
  0x12   :  { %109 = vsyncadd [#allocation3], 4294967232  ;;  %v27_v0 = vlaneseq  ;;  %v113_v1 = vmov 1983009808   ;;  %v25_v7 = vld [vmem:[%s158_s1] sm:$0x3] }
  0x13   :  { %v37_v2 = vunpack.c.l.s4 %v113_v1  ;;  %v24_v12 = vld [vmem:[#allocation2] sm:$0xf]  ;;  %s114_s23 = smov [#allocation5]  }
  0x14   :  { %v28_v3 = vshrl.u32 %v27_v0, 7  ;;  %s52_s0 = sshll.u32 %s114_s23, 4  ;;  %s53_s0 = int_to_ptr.vmem [resolvable:$true] %s52_s0 }
  0x15   :  { %v38_v6 = vunpack.c.0.s8 %v37_v2  ;;  %s86_s24 = scalar_lea.vmem %s53_s0, 64  ;;  %p91_p9 = scmp.lt.s32.totalorder %s53_s0, %s53_s0 }
  0x16   :  { %v29_v4 = vsub.s32 0, %v28_v3  ;;  %v33_v5 = vsub.s32 1, %v28_v3  ;;  %p87_p8 = scmp.ne.s32.totalorder %s53_s0, %s86_s24  ;;  %p92_p10 = scmp.lt.s32.totalorder %s86_s24, %s86_s24 }
  0x17   :  { %v41_v10 = vsub.s32 %v38_v6, %v28_v3 }
  0x18   :  { %v30_v8 = vrot.slane %v25_v7, %v29_v4  ;;  %v34_v9 = vrot.slane %v25_v7, %v33_v5  ;;  %p93_p11 = por %p92_p10, %p91_p9 }
  0x1a   :  { %v35_v11 = vcombine.low %v30_v8, %v34_v9  ;;  %p94_p12 = pnand %p93_p11, %p87_p8 }
  0x1c   :  { %v42_v13 = vrot.slane %v35_v11, %v41_v10 }
  0x1e   :  { %v44_v14 = vadd.f32 %v42_v13, %v24_v12 }
  0x20   :  { %45 = vst [vmem:[#allocation5] sm:$0xf] %v44_v14 }
  0x21   :  { %97 = shalt.err (!%p94_p12)
}
  0x22   :  { %s98_s26 = scalar_lea.hbm %s159_s2, 64 }
  0x23   :  { %p99_p13 = scmp.ne.s32.totalorder %s159_s2, %s98_s26  ;;  %p102_p0 = scmp.lt.u32.totalorder %s98_s26, %s159_s2 }
  0x25   :  { %p104_p1 = pnand %p102_p0, %p99_p13 }
  0x27   :  { %107 = shalt.err (!%p104_p1)
}
  0x28   :  { %55 = dma.vmem_to_hbm [thread:$0]  %s53_s0, 64, %s159_s2, [#allocation4]  }
  0x29   :  { %110 = dma.done.wait [#allocation4], 64  }
  0x2a   :  { %111 = vsyncadd [#allocation4], 4294967232 }
  0x2b   :  { %59 = vsyncpa [#allocation3], 1 }
  0x2c   :  { %60 = vsyncpa [#allocation4], 1 }

</bundles_post_ra>
